<compile_context>
chip_gen: v5e
topology: v5e:2x2
jax: 0.10.0
libtpu: 0.0.40
codegen_flags: <defaults>
</compile_context>

<pallas_src>
import functools

import numpy as np
import jax
import jax.numpy as jnp
from jax.experimental import pallas as pl
from jax.experimental.pallas import tpu as pltpu


def _cdiv(a, b):
    return -(-a // b)


def _round_up(a, b):
    return _cdiv(a, b) * b


def _loss_stats_kernel(x_ref, y_ref,
                       sxy_ref, sxx_ref, syy_ref, abs_ref, htv_ref, wtv_ref,
                       *, hw, w):
    """Accumulate six lane-dense (1, 1, HW) partial-sum maps per core slice."""
    step = pl.program_id(1)                      # accumulation ("arbitrary") axis, last

    @pl.when(step == 0)
    def _init():
        for r in (sxy_ref, sxx_ref, syy_ref, abs_ref, htv_ref, wtv_ref):
            r[...] = jnp.zeros_like(r)

    # Widen to f32 for all arithmetic (safe on v5e; bf16 inputs still halve HBM bytes).
    x = x_ref[...].astype(jnp.float32)
    y = y_ref[...].astype(jnp.float32)

    # L1 numerator: per-lane partial sums (final cross-lane reduce is tiny XLA glue).
    abs_ref[...] += jnp.sum(jnp.abs(x - y), axis=0, keepdims=True)[None]

    # TV partial sums on x.  Each flattened row is one complete (H, W) image, so the lane
    # rolls never cross rows; wrap-around lanes are masked in the wrapper
    # (mask-after-reduce -> no per-element mask multiplies on the VPU).
    # pltpu.roll follows jnp.roll semantics: rolling by HW-k brings element i+k to slot i.
    dh = pltpu.roll(x, hw - w, axis=1) - x       # x[..., i + W] - x[..., i]
    dw = pltpu.roll(x, hw - 1, axis=1) - x       # x[..., i + 1] - x[..., i]
    htv_ref[...] += jnp.sum(dh * dh, axis=0, keepdims=True)[None]
    wtv_ref[...] += jnp.sum(dw * dw, axis=0, keepdims=True)[None]

    # Spectral-angle per-pixel sums, reduced jointly over (batch, channel) rows.
    sxy_ref[...] += jnp.sum(x * y, axis=0, keepdims=True)[None]
    sxx_ref[...] += jnp.sum(x * x, axis=0, keepdims=True)[None]
    syy_ref[...] += jnp.sum(y * y, axis=0, keepdims=True)[None]


def _plan_tiling(bc, hw, itemsize):
    """Pick (ncores, steps, tile_bc, bc_pad, vmem_limit) for the (BC, HW) layout."""
    # Sublane-packing alignment for the row tile: f32 -> 8, bf16 -> 16, 8-bit -> 32.
    ra = {4: 8, 2: 16, 1: 32}.get(itemsize, 8)
    row_bytes = hw * itemsize

    # Per-input, per-pipeline-buffer tile budget (raised from 2 MiB -> 4 MiB to amortize
    # the ~0.35us per-grid-step overhead, esp. at v7x's 3.2 TB/s).
    per_buf_budget = 4 * 1024 * 1024
    tile_cap = max(ra, (per_buf_budget // row_bytes) // ra * ra)

    # Two-way core split only when there is enough work to share (v7x / megacore);
    # on single-TC chips a size-2 "parallel" axis just runs sequentially (harmless).
    ncores = 2 if bc >= 2 * ra else 1
    rows_per_core = _cdiv(bc, ncores)
    steps = max(1, _cdiv(rows_per_core, tile_cap))
    tile_bc = _round_up(_cdiv(rows_per_core, steps), ra)
    bc_pad = ncores * steps * tile_bc            # zero-row padding, never one giant block

    # VMEM accounting: 2 inputs x 2 pipeline buffers, 6 (1,1,HW) f32 outputs x 2 buffers
    # (sublane-padded to 8 rows), plus an allowance for f32 roll/widening temporaries.
    in_bytes = 2 * 2 * tile_bc * row_bytes
    out_bytes = 6 * 2 * 8 * hw * 4
    tmp_bytes = 4 * tile_bc * hw * 4
    vmem = in_bytes + out_bytes + tmp_bytes + (2 << 20)
    vmem = int(min(max(vmem, 16 << 20), 64 << 20))
    return ncores, steps, tile_bc, bc_pad, vmem


def loss_forward(x, y, l2=0.01):
    """Forward pass of GAE/net.py::Loss.  x, y: (B, C, H, W)."""
    B, C, H, W = x.shape
    BC, HW = B * C, H * W
    itemsize = jnp.dtype(x.dtype).itemsize

    ncores, steps, tile_bc, bc_pad, vmem_limit = _plan_tiling(BC, HW, itemsize)

    # Lane-dense layout: (B,C) joint-reduction rows on sublanes, whole image on lanes.
    xf = jnp.reshape(x, (BC, HW))
    yf = jnp.reshape(y, (BC, HW))
    if bc_pad != BC:
        # Zero rows contribute 0 to every accumulated sum; denominators use B,C,H,W.
        xf = jnp.pad(xf, ((0, bc_pad - BC), (0, 0)))
        yf = jnp.pad(yf, ((0, bc_pad - BC), (0, 0)))

    kernel = functools.partial(_loss_stats_kernel, hw=HW, w=W)

    in_spec = pl.BlockSpec((tile_bc, HW), lambda c, s, steps=steps: (c * steps + s, 0))
    map_spec = pl.BlockSpec((1, 1, HW), lambda c, s: (c, 0, 0))     # resident per core
    map_shape = jax.ShapeDtypeStruct((ncores, 1, HW), jnp.float32)

    outs = pl.pallas_call(
        kernel,
        grid=(ncores, steps),
        in_specs=[in_spec, in_spec],
        out_specs=(map_spec,) * 6,
        out_shape=(map_shape,) * 6,
        compiler_params=pltpu.CompilerParams(
            dimension_semantics=("parallel", "arbitrary"),
            vmem_limit_bytes=vmem_limit,
        ),
    )(xf, yf)

    # Combine per-core partials; everything below is O(H*W) XLA glue.
    sxy, sxx, syy, abs_map, htv_map, wtv_map = [o.sum(axis=0)[0] for o in outs]

    col = np.arange(HW)
    hmask = jnp.asarray((col < (H - 1) * W).astype(np.float32))       # valid +W diffs
    wmask = jnp.asarray(((col % W) != (W - 1)).astype(np.float32))    # valid +1 diffs

    l1 = jnp.sum(abs_map) / float(B * C * H * W)
    count_h = float(C * (H - 1) * W)
    count_w = float(C * H * (W - 1))
    h_tv = jnp.sum(htv_map * hmask)
    w_tv = jnp.sum(wtv_map * wmask)
    tv = 2.0 * (h_tv / count_h + w_tv / count_w) / B
    ls = l1 + 1e-6 * tv

    # cos = sxy / (sqrt(sxx)*sqrt(syy)) exactly as the reference (no overflow-prone
    # sxx*syy product); clamp so acos never NaNs from rounding at +/-1.
    cos = jnp.clip(sxy / (jnp.sqrt(sxx) * jnp.sqrt(syy)), -1.0, 1.0)
    # TODO(synk): acos has no guaranteed Mosaic lowering; the tiny O(H*W) arccos + mean
    # stays in XLA.  All O(B*C*H*W) work runs inside the single pallas_call above.
    le = jnp.sum(jnp.arccos(cos)) / (H * W)       # Spe_loss with shape = H (== W)

    return l1 * ls + l2 * le


def _loss_reference(x, y, l2=0.01):
    """Pure-JAX reference mirroring the PyTorch module (for validation)."""
    B, C, H, W = x.shape
    l1 = jnp.mean(jnp.abs(x - y))
    count_h = C * (H - 1) * W
    count_w = C * H * (W - 1)
    h_tv = jnp.sum((x[:, :, 1:, :] - x[:, :, :-1, :]) ** 2)
    w_tv = jnp.sum((x[:, :, :, 1:] - x[:, :, :, :-1]) ** 2)
    tv = 2.0 * (h_tv / count_h + w_tv / count_w) / B
    ls = l1 + 1e-6 * tv
    sxy = jnp.sum(x * y, axis=(0, 1))
    sxx = jnp.sum(x * x, axis=(0, 1))
    syy = jnp.sum(y * y, axis=(0, 1))
    cos = jnp.clip(sxy / (jnp.sqrt(sxx) * jnp.sqrt(syy)), -1.0, 1.0)
    le = jnp.sum(jnp.arccos(cos)) / (H * W)
    return l1 * ls + l2 * le


if __name__ == "__main__":
    key = jax.random.PRNGKey(0)
    kx, ky = jax.random.split(key)
    B, C, H, W = 2, 4, 16, 16
    x = jax.random.normal(kx, (B, C, H, W), dtype=jnp.float32)
    y = jax.random.normal(ky, (B, C, H, W), dtype=jnp.float32)

    out = jax.jit(loss_forward)(x, y)
    jax.block_until_ready(out)

    ref = _loss_reference(x, y)
    assert out.shape == () and bool(jnp.isfinite(out))
    assert bool(jnp.allclose(out, ref, rtol=1e-4, atol=1e-5)), (out, ref)
    print("KERNEL_OK")
</pallas_src>

<mosaic_0001>
module attributes {stable_mosaic.version = 11 : i64} {
  func.func @_loss_stats_kernel(%arg0: i32, %arg1: i32, %arg2: memref<8x256xf32, #tpu.memory_space<vmem>>, %arg3: memref<8x256xf32, #tpu.memory_space<vmem>>, %arg4: memref<1x1x256xf32, #tpu.memory_space<vmem>>, %arg5: memref<1x1x256xf32, #tpu.memory_space<vmem>>, %arg6: memref<1x1x256xf32, #tpu.memory_space<vmem>>, %arg7: memref<1x1x256xf32, #tpu.memory_space<vmem>>, %arg8: memref<1x1x256xf32, #tpu.memory_space<vmem>>, %arg9: memref<1x1x256xf32, #tpu.memory_space<vmem>>) attributes {dimension_semantics = [#tpu.dimension_semantics<parallel>, #tpu.dimension_semantics<arbitrary>], iteration_bounds = array<i64: 1, 1>, scalar_prefetch = 0 : i64, scratch_operands = 0 : i64, tpu.core_type = #tpu.core_type<tc>, window_params = [{transform_indices = @transform_0, window_bounds = array<i64: 8, 256>}, {transform_indices = @transform_1, window_bounds = array<i64: 8, 256>}, {transform_indices = @transform_2, window_bounds = array<i64: 1, 1, 256>}, {transform_indices = @transform_3, window_bounds = array<i64: 1, 1, 256>}, {transform_indices = @transform_4, window_bounds = array<i64: 1, 1, 256>}, {transform_indices = @transform_5, window_bounds = array<i64: 1, 1, 256>}, {transform_indices = @transform_6, window_bounds = array<i64: 1, 1, 256>}, {transform_indices = @transform_7, window_bounds = array<i64: 1, 1, 256>}]} {
    %c0_i32 = arith.constant 0 : i32
    %0 = arith.cmpi eq, %arg1, %c0_i32 : i32
    %1 = arith.extui %0 : i1 to i32
    %c0_i32_0 = arith.constant 0 : i32
    %2 = arith.cmpi ne, %1, %c0_i32_0 : i32
    scf.if %2 {
      %cst_45 = arith.constant 0.000000e+00 : f32
      %52 = vector.broadcast %cst_45 : f32 to vector<1x1x256xf32>
      %c0_46 = arith.constant 0 : index
      %c0_47 = arith.constant 0 : index
      %c0_48 = arith.constant 0 : index
      %53 = vector.load %arg4[%c0_46, %c0_47, %c0_48] : memref<1x1x256xf32, #tpu.memory_space<vmem>>, vector<1x1x256xf32>
      tpu.vector_store %arg4[%c0_46, %c0_47, %c0_48], %52 {strides = array<i32>} : memref<1x1x256xf32, #tpu.memory_space<vmem>>, vector<1x1x256xf32>,
      %cst_49 = arith.constant 0.000000e+00 : f32
      %54 = vector.broadcast %cst_49 : f32 to vector<1x1x256xf32>
      %c0_50 = arith.constant 0 : index
      %c0_51 = arith.constant 0 : index
      %c0_52 = arith.constant 0 : index
      %55 = vector.load %arg5[%c0_50, %c0_51, %c0_52] : memref<1x1x256xf32, #tpu.memory_space<vmem>>, vector<1x1x256xf32>
      tpu.vector_store %arg5[%c0_50, %c0_51, %c0_52], %54 {strides = array<i32>} : memref<1x1x256xf32, #tpu.memory_space<vmem>>, vector<1x1x256xf32>,
      %cst_53 = arith.constant 0.000000e+00 : f32
      %56 = vector.broadcast %cst_53 : f32 to vector<1x1x256xf32>
      %c0_54 = arith.constant 0 : index
      %c0_55 = arith.constant 0 : index
      %c0_56 = arith.constant 0 : index
      %57 = vector.load %arg6[%c0_54, %c0_55, %c0_56] : memref<1x1x256xf32, #tpu.memory_space<vmem>>, vector<1x1x256xf32>
      tpu.vector_store %arg6[%c0_54, %c0_55, %c0_56], %56 {strides = array<i32>} : memref<1x1x256xf32, #tpu.memory_space<vmem>>, vector<1x1x256xf32>,
      %cst_57 = arith.constant 0.000000e+00 : f32
      %58 = vector.broadcast %cst_57 : f32 to vector<1x1x256xf32>
      %c0_58 = arith.constant 0 : index
      %c0_59 = arith.constant 0 : index
      %c0_60 = arith.constant 0 : index
      %59 = vector.load %arg7[%c0_58, %c0_59, %c0_60] : memref<1x1x256xf32, #tpu.memory_space<vmem>>, vector<1x1x256xf32>
      tpu.vector_store %arg7[%c0_58, %c0_59, %c0_60], %58 {strides = array<i32>} : memref<1x1x256xf32, #tpu.memory_space<vmem>>, vector<1x1x256xf32>,
      %cst_61 = arith.constant 0.000000e+00 : f32
      %60 = vector.broadcast %cst_61 : f32 to vector<1x1x256xf32>
      %c0_62 = arith.constant 0 : index
      %c0_63 = arith.constant 0 : index
      %c0_64 = arith.constant 0 : index
      %61 = vector.load %arg8[%c0_62, %c0_63, %c0_64] : memref<1x1x256xf32, #tpu.memory_space<vmem>>, vector<1x1x256xf32>
      tpu.vector_store %arg8[%c0_62, %c0_63, %c0_64], %60 {strides = array<i32>} : memref<1x1x256xf32, #tpu.memory_space<vmem>>, vector<1x1x256xf32>,
      %cst_65 = arith.constant 0.000000e+00 : f32
      %62 = vector.broadcast %cst_65 : f32 to vector<1x1x256xf32>
      %c0_66 = arith.constant 0 : index
      %c0_67 = arith.constant 0 : index
      %c0_68 = arith.constant 0 : index
      %63 = vector.load %arg9[%c0_66, %c0_67, %c0_68] : memref<1x1x256xf32, #tpu.memory_space<vmem>>, vector<1x1x256xf32>
      tpu.vector_store %arg9[%c0_66, %c0_67, %c0_68], %62 {strides = array<i32>} : memref<1x1x256xf32, #tpu.memory_space<vmem>>, vector<1x1x256xf32>,
    } else {
    }
    %c0 = arith.constant 0 : index
    %c0_1 = arith.constant 0 : index
    %3 = vector.load %arg2[%c0, %c0_1] : memref<8x256xf32, #tpu.memory_space<vmem>>, vector<8x256xf32>
    %c0_2 = arith.constant 0 : index
    %c0_3 = arith.constant 0 : index
    %4 = vector.load %arg3[%c0_2, %c0_3] : memref<8x256xf32, #tpu.memory_space<vmem>>, vector<8x256xf32>
    %c0_4 = arith.constant 0 : index
    %c0_5 = arith.constant 0 : index
    %c0_6 = arith.constant 0 : index
    %5 = vector.load %arg7[%c0_4, %c0_5, %c0_6] : memref<1x1x256xf32, #tpu.memory_space<vmem>>, vector<1x1x256xf32>
    %6 = arith.subf %3, %4 : vector<8x256xf32>
    %7 = math.absf %6 : vector<8x256xf32>
    %cst = arith.constant dense<0.000000e+00> : vector<256xf32>
    %8 = vector.multi_reduction <add>, %7, %cst [0] : vector<8x256xf32> to vector<256xf32>
    %9 = vector.shape_cast %8 : vector<256xf32> to vector<1x256xf32>
    %10 = vector.shape_cast %9 : vector<1x256xf32> to vector<1x1x256xf32>
    %11 = arith.addf %5, %10 : vector<1x1x256xf32>
    %c0_7 = arith.constant 0 : index
    %c0_8 = arith.constant 0 : index
    %c0_9 = arith.constant 0 : index
    %12 = vector.load %arg7[%c0_7, %c0_8, %c0_9] : memref<1x1x256xf32, #tpu.memory_space<vmem>>, vector<1x1x256xf32>
    tpu.vector_store %arg7[%c0_7, %c0_8, %c0_9], %11 {strides = array<i32>} : memref<1x1x256xf32, #tpu.memory_space<vmem>>, vector<1x1x256xf32>,
    %c240_i32 = arith.constant 240 : i32
    %13 = tpu.dynamic_rotate %3 by %c240_i32 dim 1 : vector<8x256xf32>, i32 -> vector<8x256xf32>
    %14 = arith.subf %13, %3 : vector<8x256xf32>
    %c255_i32 = arith.constant 255 : i32
    %15 = tpu.dynamic_rotate %3 by %c255_i32 dim 1 : vector<8x256xf32>, i32 -> vector<8x256xf32>
    %16 = arith.subf %15, %3 : vector<8x256xf32>
    %c0_10 = arith.constant 0 : index
    %c0_11 = arith.constant 0 : index
    %c0_12 = arith.constant 0 : index
    %17 = vector.load %arg8[%c0_10, %c0_11, %c0_12] : memref<1x1x256xf32, #tpu.memory_space<vmem>>, vector<1x1x256xf32>
    %18 = arith.mulf %14, %14 : vector<8x256xf32>
    %cst_13 = arith.constant dense<0.000000e+00> : vector<256xf32>
    %19 = vector.multi_reduction <add>, %18, %cst_13 [0] : vector<8x256xf32> to vector<256xf32>
    %20 = vector.shape_cast %19 : vector<256xf32> to vector<1x256xf32>
    %21 = vector.shape_cast %20 : vector<1x256xf32> to vector<1x1x256xf32>
    %22 = arith.addf %17, %21 : vector<1x1x256xf32>
    %c0_14 = arith.constant 0 : index
    %c0_15 = arith.constant 0 : index
    %c0_16 = arith.constant 0 : index
    %23 = vector.load %arg8[%c0_14, %c0_15, %c0_16] : memref<1x1x256xf32, #tpu.memory_space<vmem>>, vector<1x1x256xf32>
    tpu.vector_store %arg8[%c0_14, %c0_15, %c0_16], %22 {strides = array<i32>} : memref<1x1x256xf32, #tpu.memory_space<vmem>>, vector<1x1x256xf32>,
    %c0_17 = arith.constant 0 : index
    %c0_18 = arith.constant 0 : index
    %c0_19 = arith.constant 0 : index
    %24 = vector.load %arg9[%c0_17, %c0_18, %c0_19] : memref<1x1x256xf32, #tpu.memory_space<vmem>>, vector<1x1x256xf32>
    %25 = arith.mulf %16, %16 : vector<8x256xf32>
    %cst_20 = arith.constant dense<0.000000e+00> : vector<256xf32>
    %26 = vector.multi_reduction <add>, %25, %cst_20 [0] : vector<8x256xf32> to vector<256xf32>
    %27 = vector.shape_cast %26 : vector<256xf32> to vector<1x256xf32>
    %28 = vector.shape_cast %27 : vector<1x256xf32> to vector<1x1x256xf32>
    %29 = arith.addf %24, %28 : vector<1x1x256xf32>
    %c0_21 = arith.constant 0 : index
    %c0_22 = arith.constant 0 : index
    %c0_23 = arith.constant 0 : index
    %30 = vector.load %arg9[%c0_21, %c0_22, %c0_23] : memref<1x1x256xf32, #tpu.memory_space<vmem>>, vector<1x1x256xf32>
    tpu.vector_store %arg9[%c0_21, %c0_22, %c0_23], %29 {strides = array<i32>} : memref<1x1x256xf32, #tpu.memory_space<vmem>>, vector<1x1x256xf32>,
    %c0_24 = arith.constant 0 : index
    %c0_25 = arith.constant 0 : index
    %c0_26 = arith.constant 0 : index
    %31 = vector.load %arg4[%c0_24, %c0_25, %c0_26] : memref<1x1x256xf32, #tpu.memory_space<vmem>>, vector<1x1x256xf32>
    %32 = arith.mulf %3, %4 : vector<8x256xf32>
    %cst_27 = arith.constant dense<0.000000e+00> : vector<256xf32>
    %33 = vector.multi_reduction <add>, %32, %cst_27 [0] : vector<8x256xf32> to vector<256xf32>
    %34 = vector.shape_cast %33 : vector<256xf32> to vector<1x256xf32>
    %35 = vector.shape_cast %34 : vector<1x256xf32> to vector<1x1x256xf32>
    %36 = arith.addf %31, %35 : vector<1x1x256xf32>
    %c0_28 = arith.constant 0 : index
    %c0_29 = arith.constant 0 : index
    %c0_30 = arith.constant 0 : index
    %37 = vector.load %arg4[%c0_28, %c0_29, %c0_30] : memref<1x1x256xf32, #tpu.memory_space<vmem>>, vector<1x1x256xf32>
    tpu.vector_store %arg4[%c0_28, %c0_29, %c0_30], %36 {strides = array<i32>} : memref<1x1x256xf32, #tpu.memory_space<vmem>>, vector<1x1x256xf32>,
    %c0_31 = arith.constant 0 : index
    %c0_32 = arith.constant 0 : index
    %c0_33 = arith.constant 0 : index
    %38 = vector.load %arg5[%c0_31, %c0_32, %c0_33] : memref<1x1x256xf32, #tpu.memory_space<vmem>>, vector<1x1x256xf32>
    %39 = arith.mulf %3, %3 : vector<8x256xf32>
    %cst_34 = arith.constant dense<0.000000e+00> : vector<256xf32>
    %40 = vector.multi_reduction <add>, %39, %cst_34 [0] : vector<8x256xf32> to vector<256xf32>
    %41 = vector.shape_cast %40 : vector<256xf32> to vector<1x256xf32>
    %42 = vector.shape_cast %41 : vector<1x256xf32> to vector<1x1x256xf32>
    %43 = arith.addf %38, %42 : vector<1x1x256xf32>
    %c0_35 = arith.constant 0 : index
    %c0_36 = arith.constant 0 : index
    %c0_37 = arith.constant 0 : index
    %44 = vector.load %arg5[%c0_35, %c0_36, %c0_37] : memref<1x1x256xf32, #tpu.memory_space<vmem>>, vector<1x1x256xf32>
    tpu.vector_store %arg5[%c0_35, %c0_36, %c0_37], %43 {strides = array<i32>} : memref<1x1x256xf32, #tpu.memory_space<vmem>>, vector<1x1x256xf32>,
    %c0_38 = arith.constant 0 : index
    %c0_39 = arith.constant 0 : index
    %c0_40 = arith.constant 0 : index
    %45 = vector.load %arg6[%c0_38, %c0_39, %c0_40] : memref<1x1x256xf32, #tpu.memory_space<vmem>>, vector<1x1x256xf32>
    %46 = arith.mulf %4, %4 : vector<8x256xf32>
    %cst_41 = arith.constant dense<0.000000e+00> : vector<256xf32>
    %47 = vector.multi_reduction <add>, %46, %cst_41 [0] : vector<8x256xf32> to vector<256xf32>
    %48 = vector.shape_cast %47 : vector<256xf32> to vector<1x256xf32>
    %49 = vector.shape_cast %48 : vector<1x256xf32> to vector<1x1x256xf32>
    %50 = arith.addf %45, %49 : vector<1x1x256xf32>
    %c0_42 = arith.constant 0 : index
    %c0_43 = arith.constant 0 : index
    %c0_44 = arith.constant 0 : index
    %51 = vector.load %arg6[%c0_42, %c0_43, %c0_44] : memref<1x1x256xf32, #tpu.memory_space<vmem>>, vector<1x1x256xf32>
    tpu.vector_store %arg6[%c0_42, %c0_43, %c0_44], %50 {strides = array<i32>} : memref<1x1x256xf32, #tpu.memory_space<vmem>>, vector<1x1x256xf32>,
    return
  }
  func.func @transform_0(%arg0: i32, %arg1: i32) -> (i32, i32) {
    %c1_i32 = arith.constant 1 : i32
    %0 = arith.muli %arg0, %c1_i32 : i32
    %1 = arith.addi %0, %arg1 : i32
    %c0_i32 = arith.constant 0 : i32
    %c0_i32_0 = arith.constant 0 : i32
    return %1, %c0_i32 : i32, i32
  }
  func.func @transform_1(%arg0: i32, %arg1: i32) -> (i32, i32) {
    %c1_i32 = arith.constant 1 : i32
    %0 = arith.muli %arg0, %c1_i32 : i32
    %1 = arith.addi %0, %arg1 : i32
    %c0_i32 = arith.constant 0 : i32
    %c0_i32_0 = arith.constant 0 : i32
    return %1, %c0_i32 : i32, i32
  }
  func.func @transform_2(%arg0: i32, %arg1: i32) -> (i32, i32, i32) {
    %c0_i32 = arith.constant 0 : i32
    %c0_i32_0 = arith.constant 0 : i32
    %c0_i32_1 = arith.constant 0 : i32
    return %arg0, %c0_i32, %c0_i32_0 : i32, i32, i32
  }
  func.func @transform_3(%arg0: i32, %arg1: i32) -> (i32, i32, i32) {
    %c0_i32 = arith.constant 0 : i32
    %c0_i32_0 = arith.constant 0 : i32
    %c0_i32_1 = arith.constant 0 : i32
    return %arg0, %c0_i32, %c0_i32_0 : i32, i32, i32
  }
  func.func @transform_4(%arg0: i32, %arg1: i32) -> (i32, i32, i32) {
    %c0_i32 = arith.constant 0 : i32
    %c0_i32_0 = arith.constant 0 : i32
    %c0_i32_1 = arith.constant 0 : i32
    return %arg0, %c0_i32, %c0_i32_0 : i32, i32, i32
  }
  func.func @transform_5(%arg0: i32, %arg1: i32) -> (i32, i32, i32) {
    %c0_i32 = arith.constant 0 : i32
    %c0_i32_0 = arith.constant 0 : i32
    %c0_i32_1 = arith.constant 0 : i32
    return %arg0, %c0_i32, %c0_i32_0 : i32, i32, i32
  }
  func.func @transform_6(%arg0: i32, %arg1: i32) -> (i32, i32, i32) {
    %c0_i32 = arith.constant 0 : i32
    %c0_i32_0 = arith.constant 0 : i32
    %c0_i32_1 = arith.constant 0 : i32
    return %arg0, %c0_i32, %c0_i32_0 : i32, i32, i32
  }
  func.func @transform_7(%arg0: i32, %arg1: i32) -> (i32, i32, i32) {
    %c0_i32 = arith.constant 0 : i32
    %c0_i32_0 = arith.constant 0 : i32
    %c0_i32_1 = arith.constant 0 : i32
    return %arg0, %c0_i32, %c0_i32_0 : i32, i32, i32
  }
}

</mosaic_0001>

<bundles_post_ra>
// kernel: loss_forward.1
= control target key start
LH: loop header
LB: loop body
LE: loop exit
PB: predicated region body
PF: predicated region fallthrough
CT: control target
= control target key end

     0   :  { %s273_s26 = smov 127   ;;  %s274_s27 = smov 112   ;;  %v61_v34 = vlaneseq  ;;  %v275_v40 = vmov 0.0   ;;  %vm95_vm1 = vcmask 1040384   ;;  %s438_s0 = inlined_call_operand.vmem [shape: f32[8,256], index: 0, kind: input, shape index: {}]   ;;  %s439_s1 = inlined_call_operand.vmem [shape: f32[8,256], index: 1, kind: input, shape index: {}]   ;;  %s440_s2 = inlined_call_operand.vmem [shape: f32[1,1,256], index: 2, kind: output, shape index: {0}]   ;;  %s441_s3 = inlined_call_operand.vmem [shape: f32[1,1,256], index: 3, kind: output, shape index: {1}]   ;;  %s442_s4 = inlined_call_operand.vmem [shape: f32[1,1,256], index: 4, kind: output, shape index: {2}]   ;;  %s443_s5 = inlined_call_operand.vmem [shape: f32[1,1,256], index: 5, kind: output, shape index: {3}]   ;;  %s444_s7 = inlined_call_operand.vmem [shape: f32[1,1,256], index: 7, kind: output, shape index: {5}]   ;;  %s445_s6 = inlined_call_operand.vmem [shape: f32[1,1,256], index: 6, kind: output, shape index: {4}]  }
   0x1   :  { %v319_v0 = vld [vmem:[%s438_s0] sm:$0xff]  ;;  %v326_v1 = vld [vmem:[%s438_s0 + $0x8] sm:$0xff] }
   0x2   :  { %115 = vrot.lane.b32.xlu1 %v319_v0, %s273_s26  ;;  %104 = vrot.lane.b32.xlu0 %v319_v0, %s274_s27  ;;  %v74_v2 = vld [vmem:[%s439_s1 + $0x8] sm:$0xff]  ;;  %v73_v4 = vld [vmem:[%s439_s1] sm:$0xff]  ;;  %v192_v25 = vmul.f32 %v326_v1, %v326_v1  ;;  %v191_v30 = vmul.f32 %v319_v0, %v319_v0  ;;  %vm345_vm0 = vcmp.lt.s32.totalorder %v61_v34, 256 }
   0x3   :  { %v77_v3 = vsub.f32 %v326_v1, %v74_v2  ;;  %v214_v5 = vmul.f32 %v74_v2, %v74_v2  ;;  %v76_v6 = vsub.f32 %v319_v0, %v73_v4  ;;  %v213_v8 = vmul.f32 %v73_v4, %v73_v4  ;;  %65 = vst.msk [vmem:[%s440_s2] sm:$0x3] %vm345_vm0, %v275_v40 }
   0x4   :  { %v170_v24 = vmul.f32 %v74_v2, %v326_v1  ;;  %v169_v29 = vmul.f32 %v73_v4, %v319_v0  ;;  %v199_v33 = vrot.slane %v192_v25, 4  ;;  %v193_v42 = vrot.slane %v191_v30, 4  ;;  %66 = vst.msk [vmem:[%s441_s3] sm:$0x3] %vm345_vm0, %v275_v40 }
   0x5   :  { %v79_v7 = vand.u32 2147483647, %v77_v3  ;;  %v221_v9 = vrot.slane %v214_v5, 4  ;;  %v78_v10 = vand.u32 2147483647, %v76_v6  ;;  %v215_v12 = vrot.slane %v213_v8, 4 }
   0x6   :  { %v177_v32 = vrot.slane %v170_v24, 4  ;;  %v171_v41 = vrot.slane %v169_v29, 4  ;;  %v200_v44 = vadd.f32 %v199_v33, %v192_v25  ;;  %67 = vst.msk [vmem:[%s442_s4] sm:$0x3] %vm345_vm0, %v275_v40  ;;  %v194_v50 = vadd.f32 %v193_v42, %v191_v30 }
   0x7   :  { %v86_v11 = vrot.slane %v79_v7, 4  ;;  %v222_v13 = vadd.f32 %v221_v9, %v214_v5  ;;  %v80_v14 = vrot.slane %v78_v10, 4  ;;  %v216_v16 = vadd.f32 %v215_v12, %v213_v8  ;;  %68 = vst.msk [vmem:[%s443_s5] sm:$0x3] %vm345_vm0, %v275_v40 }
   0x8   :  { %v178_v43 = vadd.f32 %v177_v32, %v170_v24  ;;  %70 = vst.msk [vmem:[%s444_s7] sm:$0x3] %vm345_vm0, %v275_v40  ;;  %v172_v49 = vadd.f32 %v171_v41, %v169_v29  ;;  %v201_v52 = vrot.slane %v200_v44, 2  ;;  %v195_v56 = vrot.slane %v194_v50, 2 }
   0x9   :  { %v87_v15 = vadd.f32 %v86_v11, %v79_v7  ;;  %v223_v17 = vrot.slane %v222_v13, 2  ;;  %v81_v18 = vadd.f32 %v80_v14, %v78_v10  ;;  %v217_v20 = vrot.slane %v216_v16, 2  ;;  %69 = vst.msk [vmem:[%s445_s6] sm:$0x3] %vm345_vm0, %v275_v40 }
   0xa   :  { %117 = vrot.lane.b32.xlu1 %v326_v1, %s273_s26  ;;  %106 = vrot.lane.b32.xlu0 %v326_v1, %s274_s27  ;;  %v179_v51 = vrot.slane %v178_v43, 2  ;;  %v173_v55 = vrot.slane %v172_v49, 2  ;;  %v202_v58 = vadd.f32 %v201_v52, %v200_v44  ;;  %v196_v2 = vadd.f32 %v195_v56, %v194_v50 }
   0xb   :  { %v88_v19 = vrot.slane %v87_v15, 2  ;;  %v224_v21 = vadd.f32 %v223_v17, %v222_v13  ;;  %v82_v22 = vrot.slane %v81_v18, 2  ;;  %v218_v26 = vadd.f32 %v217_v20, %v216_v16  ;;  %v168_v13 = vld [vmem:[%s440_s2] sm:$0x3] }
   0xc   :  { %v180_v57 = vadd.f32 %v179_v51, %v178_v43  ;;  %v174_v63 = vadd.f32 %v173_v55, %v172_v49  ;;  %v203_v4 = vrot.slane %v202_v58, 1  ;;  %v197_v6 = vrot.slane %v196_v2, 1  ;;  %v190_v14 = vld [vmem:[%s441_s3] sm:$0x3] }
   0xd   :  { %v89_v23 = vadd.f32 %v88_v19, %v87_v15  ;;  %v225_v27 = vrot.slane %v224_v21, 1  ;;  %v83_v28 = vadd.f32 %v82_v22, %v81_v18  ;;  %v219_v35 = vrot.slane %v218_v26, 1  ;;  %v212_v59 = vld [vmem:[%s442_s4] sm:$0x3] }
   0xe   :  { %v75_v60 = vld [vmem:[%s443_s5] sm:$0x3]  ;;  %v181_v3 = vrot.slane %v180_v57, 1  ;;  %v175_v5 = vrot.slane %v174_v63, 1  ;;  %v204_v8 = vadd.f32 %v203_v4, %v202_v58  ;;  %v198_v10 = vadd.f32 %v197_v6, %v196_v2 }
   0xf   :  { %v90_v31 = vrot.slane %v89_v23, 1  ;;  %v226_v36 = vadd.f32 %v225_v27, %v224_v21  ;;  %v84_v38 = vrot.slane %v83_v28, 1  ;;  %v220_v45 = vadd.f32 %v219_v35, %v218_v26 }
  0x10   :  { %v182_v7 = vadd.f32 %v181_v3, %v180_v57  ;;  %v176_v9 = vadd.f32 %v175_v5, %v174_v63  ;;  %v207_v12 = vrot.slane %v204_v8, 7  ;;  %v109_v21 = vand.u32 127, %v61_v34  ;;  %v146_v57 = vld [vmem:[%s444_s7] sm:$0x3] }
  0x11   :  { %v91_v39 = vadd.f32 %v90_v31, %v89_v23  ;;  %v229_v46 = vrot.slane %v226_v36, 7  ;;  %v85_v47 = vadd.f32 %v84_v38, %v83_v28 }
  0x12   :  { %v185_v11 = vrot.slane %v182_v7, 7  ;;  %v208_v16 = vsel %vm95_vm1, %v198_v10, %v207_v12  ;;  %vm119_vm2 = vcmp.lt.s32.totalorder %v109_v21, 127  ;;  %vm110_vm3 = vcmp.lt.s32.totalorder %v109_v21, 112 }
  0x13   :  { %v94_v48 = vrot.slane %v91_v39, 7  ;;  %v230_v53 = vsel %vm95_vm1, %v220_v45, %v229_v46  ;;  %v210_v18 = vadd.f32 %v208_v16, %v190_v14 }
  0x14   :  { %v232_v61 = vadd.f32 %v230_v53, %v212_v59  ;;  %v186_v15 = vsel %vm95_vm1, %v176_v9, %v185_v11 }
  0x15   :  { %v96_v54 = vsel %vm95_vm1, %v85_v47, %v94_v48  ;;  %v188_v17 = vadd.f32 %v186_v15, %v168_v13  ;;  %211 = vst.msk [vmem:[%s441_s3] sm:$0x3] %vm345_vm0, %v210_v18 }
  0x16   :  { %v98_v62 = vadd.f32 %v96_v54, %v75_v60  ;;  %233 = vst.msk [vmem:[%s442_s4] sm:$0x3] %vm345_vm0, %v232_v61  ;;  %v124_v60 = vld [vmem:[%s445_s6] sm:$0x3] }
  0x17   :  { %189 = vst.msk [vmem:[%s440_s2] sm:$0x3] %vm345_vm0, %v188_v17 }
  0x18   :  { %103 = vst.msk [vmem:[%s443_s5] sm:$0x3] %vm345_vm0, %v98_v62 }
  0x74   :  { %v116_v19 = vpop.permute.xlu1 %115  ;;  %v105_v20 = vpop.permute.xlu0 %104 }
  0x7c   :  { %v118_v22 = vpop.permute.xlu1 %117  ;;  %v107_v25 = vpop.permute.xlu0 %106 }
  0x7d   :  { %v120_v23 = vsel %vm119_vm2, %v116_v19, %v118_v22  ;;  %v121_v24 = vsel %vm119_vm2, %v118_v22, %v116_v19  ;;  %v111_v28 = vsel %vm110_vm3, %v105_v20, %v107_v25  ;;  %v112_v29 = vsel %vm110_vm3, %v107_v25, %v105_v20 }
  0x7e   :  { %v122_v26 = vsub.f32 %v120_v23, %v319_v0  ;;  %v123_v27 = vsub.f32 %v121_v24, %v326_v1  ;;  %v113_v30 = vsub.f32 %v111_v28, %v319_v0  ;;  %v114_v31 = vsub.f32 %v112_v29, %v326_v1 }
  0x80   :  { %v147_v32 = vmul.f32 %v122_v26, %v122_v26  ;;  %v148_v33 = vmul.f32 %v123_v27, %v123_v27  ;;  %v125_v35 = vmul.f32 %v113_v30, %v113_v30  ;;  %v126_v34 = vmul.f32 %v114_v31, %v114_v31 }
  0x82   :  { %v149_v36 = vrot.slane %v147_v32, 4  ;;  %v155_v38 = vrot.slane %v148_v33, 4  ;;  %v127_v39 = vrot.slane %v125_v35, 4  ;;  %v133_v40 = vrot.slane %v126_v34, 4 }
  0x84   :  { %v150_v41 = vadd.f32 %v149_v36, %v147_v32  ;;  %v156_v42 = vadd.f32 %v155_v38, %v148_v33  ;;  %v128_v43 = vadd.f32 %v127_v39, %v125_v35  ;;  %v134_v44 = vadd.f32 %v133_v40, %v126_v34 }
  0x86   :  { %v151_v45 = vrot.slane %v150_v41, 2  ;;  %v157_v46 = vrot.slane %v156_v42, 2  ;;  %v129_v47 = vrot.slane %v128_v43, 2  ;;  %v135_v48 = vrot.slane %v134_v44, 2 }
  0x88   :  { %v152_v49 = vadd.f32 %v151_v45, %v150_v41  ;;  %v158_v0 = vadd.f32 %v157_v46, %v156_v42  ;;  %v130_v50 = vadd.f32 %v129_v47, %v128_v43  ;;  %v136_v1 = vadd.f32 %v135_v48, %v134_v44 }
  0x8a   :  { %v153_v51 = vrot.slane %v152_v49, 1  ;;  %v159_v52 = vrot.slane %v158_v0, 1  ;;  %v131_v53 = vrot.slane %v130_v50, 1  ;;  %v137_v54 = vrot.slane %v136_v1, 1 }
  0x8c   :  { %v160_v55 = vadd.f32 %v159_v52, %v158_v0  ;;  %v138_v56 = vadd.f32 %v137_v54, %v136_v1  ;;  %v154_v58 = vadd.f32 %v153_v51, %v152_v49  ;;  %v132_v61 = vadd.f32 %v131_v53, %v130_v50 }
  0x8e   :  { %v163_v59 = vrot.slane %v160_v55, 7  ;;  %v141_v62 = vrot.slane %v138_v56, 7 }
  0x90   :  { %v164_v63 = vsel %vm95_vm1, %v154_v58, %v163_v59  ;;  %v142_v3 = vsel %vm95_vm1, %v132_v61, %v141_v62 }
  0x91   :  { %v166_v2 = vadd.f32 %v164_v63, %v146_v57  ;;  %v144_v4 = vadd.f32 %v142_v3, %v124_v60 }
  0x93   :  { %167 = vst.msk [vmem:[%s444_s7] sm:$0x3] %vm345_vm0, %v166_v2 }
  0x94   :  { %145 = vst.msk [vmem:[%s445_s6] sm:$0x3] %vm345_vm0, %v144_v4 }

</bundles_post_ra>
